<compile_context>
chip_gen: v6e
topology: v6e:2x2x1
jax: 0.10.0
libtpu: 0.0.40
codegen_flags: <defaults>
</compile_context>

<pallas_src>
import functools

import jax
import jax.numpy as jnp
from jax.experimental import pallas as pl
from jax.experimental.pallas import tpu as pltpu

_LANE = 128
_SUBLANE = 8
_MAX_TP = 16384  # lane-tile cap (multiple of 128)


def _round_down(x, m):
    return (x // m) * m


def _round_up(x, m):
    return -(-x // m) * m


def _chip_config():
    """Generation-aware tiling / VMEM knobs (conservative on unknown chips)."""
    kind = ""
    try:
        kind = (getattr(jax.devices()[0], "device_kind", "") or "").lower()
    except Exception:
        pass
    if "v7" in kind:
        # 64 MiB VMEM per TC, ~3.2 TB/s HBM, 2 TensorCores per chip.
        return {"block_bytes": 12 << 20, "vmem_limit": 48 << 20, "two_row_blocks": True}
    if "v6" in kind:
        # 128 MiB VMEM, ~1.4 TB/s HBM, 1 TC (scoped default is only 32 MiB).
        return {"block_bytes": 12 << 20, "vmem_limit": 64 << 20, "two_row_blocks": False}
    if "v5" in kind:
        # v5e/v5p: scoped default 16/32 MiB is the binding constraint.
        return {"block_bytes": 6 << 20, "vmem_limit": 32 << 20, "two_row_blocks": False}
    return {"block_bytes": 4 << 20, "vmem_limit": None, "two_row_blocks": False}


def _gap_kernel(x_ref, o_ref, acc_ref, *, p, tp, lane_blocks, inv_count,
                out_dtype, need_mask):
    l = pl.program_id(1)
    last = pl.num_programs(1) - 1

    @pl.when(l == 0)
    def _init():
        acc_ref[...] = jnp.zeros_like(acc_ref)

    def _accumulate(x):
        x = x.astype(jnp.float32)
        if lane_blocks > 1:
            # Fold the tp-wide tile into a 128-lane partial sum with purely
            # lane-aligned vreg adds (no relayout, no cross-lane movement).
            tot = x[:, :_LANE]
            for j in range(1, lane_blocks):
                tot = tot + x[:, j * _LANE:(j + 1) * _LANE]
            acc_ref[...] += tot
        else:
            acc_ref[...] += x

    if need_mask:
        # Only the final lane tile is ragged; keep the steady state unmasked.
        @pl.when(l != last)
        def _hot():
            _accumulate(x_ref[...])

        @pl.when(l == last)
        def _ragged():
            x = x_ref[...].astype(jnp.float32)
            lane = jax.lax.broadcasted_iota(jnp.int32, x.shape, 1) + l * tp
            _accumulate(jnp.where(lane < p, x, 0.0))
    else:
        _accumulate(x_ref[...])

    @pl.when(l == last)
    def _finalize():
        acc = acc_ref[...]
        if acc.shape[-1] > 1:
            acc = jnp.sum(acc, axis=-1, keepdims=True)  # single cross-lane reduce
        o_ref[...] = (acc * jnp.float32(inv_count)).astype(out_dtype)


def _gap_fold_kernel(x_ref, o_ref, *, k, p, inv_count, out_dtype):
    # Each 128-lane row holds k pooling windows of p elements each.
    x = x_ref[...].astype(jnp.float32)  # (tr, 128)
    for f in range(k):
        s = jnp.sum(x[:, f * p:(f + 1) * p], axis=1, keepdims=True)  # (tr, 1)
        o_ref[:, f:f + 1] = (s * jnp.float32(inv_count)).astype(out_dtype)


def global_avg_pooling(x, keep_dims=False):
    """x: (N, C, H, W). Returns (N, C) (or (N, C, 1, 1) if keep_dims), dtype of x."""
    n, c, h, w = x.shape
    out_dtype = x.dtype
    rows = n * c
    p = h * w
    itemsize = jnp.dtype(x.dtype).itemsize

    cfg = _chip_config()
    block_bytes = cfg["block_bytes"]

    cost = pl.CostEstimate(
        flops=rows * p,
        transcendentals=0,
        bytes_accessed=rows * p * itemsize + rows * jnp.dtype(out_dtype).itemsize,
    )

    # ---- Folded path: small spatial windows packed into full 128-lane rows ----
    k_fold = (_LANE // p) if (2 <= p < _LANE and _LANE % p == 0) else 0
    if k_fold and rows % k_fold == 0:
        rows2 = rows // k_fold
        x2 = x.reshape(rows2, _LANE)  # free row-major reshape

        if rows2 <= _SUBLANE:
            tr = rows2
        else:
            tr_cap = max(_SUBLANE,
                         _round_down(block_bytes // (_LANE * itemsize), _SUBLANE))
            tr = min(tr_cap, _round_down(rows2, _SUBLANE))
            if cfg["two_row_blocks"] and rows2 >= 2 * _SUBLANE:
                tr = min(tr, _round_up(-(-rows2 // 2), _SUBLANE))
        grid_r = pl.cdiv(rows2, tr)

        out = pl.pallas_call(
            functools.partial(_gap_fold_kernel, k=k_fold, p=p,
                              inv_count=1.0 / float(p), out_dtype=out_dtype),
            out_shape=jax.ShapeDtypeStruct((rows2, k_fold), out_dtype),
            grid_spec=pltpu.PrefetchScalarGridSpec(
                num_scalar_prefetch=0,
                grid=(grid_r,),
                in_specs=[pl.BlockSpec((tr, _LANE), lambda r: (r, 0))],
                out_specs=pl.BlockSpec((tr, k_fold), lambda r: (r, 0)),
            ),
            compiler_params=pltpu.CompilerParams(
                dimension_semantics=("parallel",),
                vmem_limit_bytes=cfg["vmem_limit"],
            ),
            cost_estimate=cost,
        )(x2)
        out = out.reshape(rows, 1)

    # ---- General path: (rows, p) with lane-axis reduction ----
    else:
        x2 = x.reshape(rows, p)  # free row-major reshape

        if p >= _LANE:
            lane_budget = max(_LANE,
                              _round_down(block_bytes // (_SUBLANE * itemsize), _LANE))
            tp = min(_round_down(p, _LANE), _MAX_TP, lane_budget)
        else:
            tp = p
        need_mask = (p % tp) != 0
        grid_l = pl.cdiv(p, tp)
        lane_blocks = tp // _LANE if tp % _LANE == 0 else 1
        acc_w = _LANE if tp % _LANE == 0 else tp

        if rows <= _SUBLANE:
            tr = rows  # full dim (allowed); tiny block
        else:
            tr_cap = max(_SUBLANE,
                         _round_down(block_bytes // max(1, tp * itemsize), _SUBLANE))
            tr = min(tr_cap, _round_down(rows, _SUBLANE))
            if cfg["two_row_blocks"] and rows >= 2 * _SUBLANE:
                # Keep >= 2 row blocks so the "parallel" axis spans both TCs.
                tr = min(tr, _round_up(-(-rows // 2), _SUBLANE))
        grid_r = pl.cdiv(rows, tr)

        out = pl.pallas_call(
            functools.partial(
                _gap_kernel, p=p, tp=tp, lane_blocks=lane_blocks,
                inv_count=1.0 / float(p), out_dtype=out_dtype, need_mask=need_mask),
            out_shape=jax.ShapeDtypeStruct((rows, 1), out_dtype),
            grid_spec=pltpu.PrefetchScalarGridSpec(
                num_scalar_prefetch=0,
                grid=(grid_r, grid_l),
                in_specs=[pl.BlockSpec((tr, tp), lambda r, l: (r, l))],
                out_specs=pl.BlockSpec((tr, 1), lambda r, l: (r, 0)),
                scratch_shapes=[pltpu.VMEM((tr, acc_w), jnp.float32)],
            ),
            compiler_params=pltpu.CompilerParams(
                dimension_semantics=("parallel", "arbitrary"),
                vmem_limit_bytes=cfg["vmem_limit"],
            ),
            cost_estimate=cost,
        )(x2)

    if keep_dims:
        return out.reshape(n, c, 1, 1)
    return out.reshape(n, c)


if __name__ == "__main__":
    key = jax.random.PRNGKey(0)
    keys = jax.random.split(key, 8)

    def ref_gap(x, keep_dims=False):
        r = jnp.mean(x.astype(jnp.float32), axis=(2, 3)).astype(x.dtype)
        if keep_dims:
            return r.reshape(x.shape[0], x.shape[1], 1, 1)
        return r

    def check(x, keep_dims=False, tol=1e-5):
        out = jax.block_until_ready(global_avg_pooling(x, keep_dims=keep_dims))
        r = ref_gap(x, keep_dims=keep_dims)
        assert out.shape == r.shape, (out.shape, r.shape)
        assert out.dtype == x.dtype, (out.dtype, x.dtype)
        assert jnp.allclose(out.astype(jnp.float32), r.astype(jnp.float32),
                            atol=tol, rtol=tol)

    # Primary shape implied by the module spec.
    x0 = jax.random.normal(keys[0], (2, 4, 16, 16), dtype=jnp.float32)
    check(x0, keep_dims=False)
    check(x0, keep_dims=True)

    # dtype round-trip (cast to f32 happens inside the kernel).
    xb = jax.random.normal(keys[1], (2, 4, 16, 16), dtype=jnp.float32).astype(jnp.bfloat16)
    check(xb, tol=1e-2)

    # Ragged lane tile (H*W = 196 -> tp = 128, pl.when-gated mask on last tile).
    check(jax.random.normal(keys[2], (2, 4, 14, 14), dtype=jnp.float32))

    # Folded small-spatial path (H*W = 64, 128 % 64 == 0 -> 2 windows per row).
    check(jax.random.normal(keys[3], (2, 4, 8, 8), dtype=jnp.float32))

    # Small non-lane-aligned spatial (H*W = 49 < 128, no fold).
    check(jax.random.normal(keys[4], (2, 4, 7, 7), dtype=jnp.float32))

    # Row count not a multiple of 8 (ragged last row block) and rows < 8.
    check(jax.random.normal(keys[5], (3, 4, 16, 16), dtype=jnp.float32))
    check(jax.random.normal(keys[6], (1, 3, 16, 16), dtype=jnp.float32))

    print("KERNEL_OK")
</pallas_src>

<mosaic_0001>
module attributes {stable_mosaic.version = 11 : i64} {
  func.func @_gap_kernel(%arg0: i32, %arg1: i32, %arg2: memref<8x256xf32, #tpu.memory_space<vmem>>, %arg3: memref<8x1xf32, #tpu.memory_space<vmem>>, %arg4: memref<8x128xf32, #tpu.memory_space<vmem>>) attributes {dimension_semantics = [#tpu.dimension_semantics<parallel>, #tpu.dimension_semantics<arbitrary>], iteration_bounds = array<i64: 1, 1>, scalar_prefetch = 0 : i64, scratch_operands = 1 : i64, tpu.core_type = #tpu.core_type<tc>, window_params = [{transform_indices = @transform_0, window_bounds = array<i64: 8, 256>}, {transform_indices = @transform_1, window_bounds = array<i64: 8, 1>}]} {
    %c0_i32 = arith.constant 0 : i32
    %0 = arith.cmpi eq, %arg1, %c0_i32 : i32
    %1 = arith.extui %0 : i1 to i32
    %c0_i32_0 = arith.constant 0 : i32
    %2 = arith.cmpi ne, %1, %c0_i32_0 : i32
    scf.if %2 {
      %cst = arith.constant 0.000000e+00 : f32
      %13 = vector.broadcast %cst : f32 to vector<8x128xf32>
      %c0_8 = arith.constant 0 : index
      %c0_9 = arith.constant 0 : index
      %14 = vector.load %arg4[%c0_8, %c0_9] : memref<8x128xf32, #tpu.memory_space<vmem>>, vector<8x128xf32>
      tpu.vector_store %arg4[%c0_8, %c0_9], %13 {strides = array<i32>} : memref<8x128xf32, #tpu.memory_space<vmem>>, vector<8x128xf32>,
    } else {
    }
    %c0 = arith.constant 0 : index
    %c0_1 = arith.constant 0 : index
    %3 = vector.load %arg2[%c0, %c0_1] : memref<8x256xf32, #tpu.memory_space<vmem>>, vector<8x256xf32>
    %4 = vector.extract_strided_slice %3 {offsets = [0, 0], sizes = [8, 128], strides = [1, 1]} : vector<8x256xf32> to vector<8x128xf32>
    %5 = vector.extract_strided_slice %3 {offsets = [0, 128], sizes = [8, 128], strides = [1, 1]} : vector<8x256xf32> to vector<8x128xf32>
    %6 = arith.addf %4, %5 : vector<8x128xf32>
    %c0_2 = arith.constant 0 : index
    %c0_3 = arith.constant 0 : index
    %7 = vector.load %arg4[%c0_2, %c0_3] : memref<8x128xf32, #tpu.memory_space<vmem>>, vector<8x128xf32>
    %8 = arith.addf %7, %6 : vector<8x128xf32>
    %c0_4 = arith.constant 0 : index
    %c0_5 = arith.constant 0 : index
    %9 = vector.load %arg4[%c0_4, %c0_5] : memref<8x128xf32, #tpu.memory_space<vmem>>, vector<8x128xf32>
    tpu.vector_store %arg4[%c0_4, %c0_5], %8 {strides = array<i32>} : memref<8x128xf32, #tpu.memory_space<vmem>>, vector<8x128xf32>,
    %c0_i32_6 = arith.constant 0 : i32
    %10 = arith.cmpi eq, %arg1, %c0_i32_6 : i32
    %11 = arith.extui %10 : i1 to i32
    %c0_i32_7 = arith.constant 0 : i32
    %12 = arith.cmpi ne, %11, %c0_i32_7 : i32
    scf.if %12 {
      %c0_8 = arith.constant 0 : index
      %c0_9 = arith.constant 0 : index
      %13 = vector.load %arg4[%c0_8, %c0_9] : memref<8x128xf32, #tpu.memory_space<vmem>>, vector<8x128xf32>
      %cst = arith.constant dense<0.000000e+00> : vector<8xf32>
      %14 = vector.multi_reduction <add>, %13, %cst [1] : vector<8x128xf32> to vector<8xf32>
      %15 = vector.shape_cast %14 : vector<8xf32> to vector<8x1xf32>
      %cst_10 = arith.constant 3.906250e-03 : f32
      %16 = vector.broadcast %cst_10 : f32 to vector<8x1xf32>
      %17 = arith.mulf %15, %16 : vector<8x1xf32>
      %c0_11 = arith.constant 0 : index
      %c0_12 = arith.constant 0 : index
      %18 = vector.load %arg3[%c0_11, %c0_12] : memref<8x1xf32, #tpu.memory_space<vmem>>, vector<8x1xf32>
      tpu.vector_store %arg3[%c0_11, %c0_12], %17 {strides = array<i32>} : memref<8x1xf32, #tpu.memory_space<vmem>>, vector<8x1xf32>,
    } else {
    }
    return
  }
  func.func @transform_0(%arg0: i32, %arg1: i32) -> (i32, i32) {
    %c0_i32 = arith.constant 0 : i32
    return %arg0, %arg1 : i32, i32
  }
  func.func @transform_1(%arg0: i32, %arg1: i32) -> (i32, i32) {
    %c0_i32 = arith.constant 0 : i32
    %c0_i32_0 = arith.constant 0 : i32
    return %arg0, %c0_i32 : i32, i32
  }
}

</mosaic_0001>

<bundles_post_ra>
// kernel: tpu_custom_call.1
= control target key start
LH: loop header
LB: loop body
LE: loop exit
PB: predicated region body
PF: predicated region fallthrough
CT: control target
= control target key end

     0   :  { %6 = vsyncpa [#allocation4], 0  ;;  %s68_s6 = smov [#allocation3]   ;;  %s85_s0 = inlined_call_operand.hbm [shape: f32[8,256], index: 0, kind: input, shape index: {}]   ;;  %s86_s1 = inlined_call_operand.vmem [shape: f32[8,1], index: 1, kind: output, shape index: {}]  }
   0x1   :  { %s13_s7 = sshll.u32 %s68_s6, 4  ;;  %s14_s7 = int_to_ptr.vmem [resolvable:$true] %s13_s7 }
   0x2   :  { %s54_s8 = scalar_lea.vmem %s14_s7, 256  ;;  %p59_p1 = scmp.lt.s32.totalorder %s14_s7, %s14_s7 }
   0x3   :  { %p55_p0 = scmp.ne.s32.totalorder %s14_s7, %s54_s8  ;;  %p60_p2 = scmp.lt.s32.totalorder %s54_s8, %s54_s8 }
   0x5   :  { %p61_p3 = por %p60_p2, %p59_p1 }
   0x7   :  { %p62_p4 = pnand %p61_p3, %p55_p0 }
   0x9   :  { %65 = shalt.err (!%p62_p4)
}
   0xa   :  { %16 = dma.hbm_to_vmem [thread:$0]  %s85_s0, 256, %s14_s7, [#allocation4]  }
   0xb   :  { %66 = dma.done.wait [#allocation4], 256  }
   0xc   :  { %67 = vsyncadd [#allocation4], 4294967040  ;;  %v25_v0 = vld [vmem:[#allocation3] sm:$0xff]  ;;  %v26_v1 = vld [vmem:[#allocation3 + $0x8] sm:$0xff]  ;;  %vm38_vm0 = vcmask 7168  }
   0xd   :  { %v27_v2 = vadd.f32 %v26_v1, %v25_v0 }
   0xf   :  { %35 = vadd.xlane.f32.xlu0 %v27_v2 }
  0x98   :  { %v36_v3 = vpop.xlane.xlu0 %35 }
  0x99   :  { %v37_v4 = vmul.f32 0.00390625, %v36_v3 }
  0x9b   :  { %39 = vst.msk [vmem:[%s86_s1] sm:$0xff] %vm38_vm0, %v37_v4 }
  0x9c   :  { %44 = vsyncpa [#allocation4], 1 }

</bundles_post_ra>
